<compile_context>
chip_gen: v6e
topology: v6e:2x2x1
jax: 0.10.0
libtpu: 0.0.40
codegen_flags: <defaults>
</compile_context>

<pallas_src>
import math

import jax
import jax.numpy as jnp
from jax.experimental import pallas as pl
from jax.experimental.pallas import tpu as pltpu


# Row-tile cap: ~1.5 KB/row of double-buffered tiles -> TM=2048 is ~3 MiB plus
# ~50 KB resident weights; budgeted against v7x's 32 MiB scoped-VMEM default.
_TM_MAX = 2048


def _round_up(x, m):
    return ((x + m - 1) // m) * m


def _row_tile(n):
    # Aim for at least 2 grid steps (v7x has 2 TensorCores; "parallel" sharding
    # does nothing with grid=(1,)), capped at _TM_MAX, multiple of 8 sublanes.
    tm = min(_TM_MAX, _round_up(max(pl.cdiv(n, 2), 1), 8))
    return max(tm, 8)


# ----------------------------------------------------------------------------
# Fused kernel:  sinusoidal -> Linear -> SiLU -> Linear   (noise-level path)
#              + Linear with dropout mask                 (external-cond path)
# ----------------------------------------------------------------------------
def _fused_embed_kernel(packed_ref, sintab_ref, w1_ref, b1_ref, w2_ref, b2_ref,
                        wc_ref, bc_ref, noise_out_ref, cond_out_ref):
    packed = packed_ref[...]                         # (TM, 2 + Dc) f32
    t = packed[:, 0:1]                               # noise level (as f32)
    keep = 1.0 - packed[:, 1:2]                      # 1 - drop mask
    cond = packed[:, 2:]                             # (TM, Dc)

    # Sinusoidal embedding with a single EUP pass: row 0 of sintab is the
    # repeated frequency table, row 1 the phase shift ([0]*half + [pi/2]*half);
    # cos(x) = sin(x + pi/2), so one sin() covers the [sin | cos] halves.
    temb = jnp.sin(t * sintab_ref[0:1, :] + sintab_ref[1:2, :])   # (TM, Dn)

    # Linear -> SiLU -> Linear: MXU in bf16, elementwise kept f32 (v5e-safe).
    # TODO(synk): on v6e/v7x the SiLU could run in bf16 (bf16 VPU/EUP there).
    h = jnp.dot(temb.astype(jnp.bfloat16), w1_ref[...],
                preferred_element_type=jnp.float32) + b1_ref[...]
    h = h * jax.nn.sigmoid(h)                        # SiLU
    o = jnp.dot(h.astype(jnp.bfloat16), w2_ref[...],
                preferred_element_type=jnp.float32) + b2_ref[...]
    noise_out_ref[...] = o.astype(noise_out_ref.dtype)

    # External-cond embedding: K=Dc contraction as VPU broadcast-FMAs
    # (Dc is tiny; an MXU matmul would waste the systolic array).
    wc = wc_ref[...]                                 # (Dc, Dce) f32
    y = jnp.broadcast_to(bc_ref[...], (cond.shape[0], wc.shape[1]))
    for k in range(cond.shape[1]):                   # static unroll (Dc small)
        y = y + cond[:, k:k + 1] * wc[k:k + 1, :]
    cond_out_ref[...] = (y * keep).astype(cond_out_ref.dtype)


# Fallback when there is no external conditioning.
def _time_embed_kernel(nl_ref, sintab_ref, w1_ref, b1_ref, w2_ref, b2_ref,
                       noise_out_ref):
    t = nl_ref[...]                                  # (TM, 1) f32
    temb = jnp.sin(t * sintab_ref[0:1, :] + sintab_ref[1:2, :])
    h = jnp.dot(temb.astype(jnp.bfloat16), w1_ref[...],
                preferred_element_type=jnp.float32) + b1_ref[...]
    h = h * jax.nn.sigmoid(h)
    o = jnp.dot(h.astype(jnp.bfloat16), w2_ref[...],
                preferred_element_type=jnp.float32) + b2_ref[...]
    noise_out_ref[...] = o.astype(noise_out_ref.dtype)


# ----------------------------------------------------------------------------
# Wrappers: tile the token dimension with a ragged-tolerant grid, keep weights
# VMEM-resident (constant index_map), mark the row axis "parallel".
# ----------------------------------------------------------------------------
def fused_condition_embed(packed, sintab, w1, b1, w2, b2, wc, bc, out_dtype):
    n, dpk = packed.shape
    dn = sintab.shape[1]
    de = w1.shape[1]
    dc, dce = wc.shape
    tm = _row_tile(n)

    return pl.pallas_call(
        _fused_embed_kernel,
        out_shape=(jax.ShapeDtypeStruct((n, de), out_dtype),
                   jax.ShapeDtypeStruct((n, dce), out_dtype)),
        grid_spec=pltpu.PrefetchScalarGridSpec(
            num_scalar_prefetch=0,
            grid=(pl.cdiv(n, tm),),          # ragged last block masked by Pallas
            in_specs=[
                pl.BlockSpec((tm, dpk), lambda i: (i, 0)),   # packed nl/mask/cond
                pl.BlockSpec((2, dn), lambda i: (0, 0)),     # freq + phase table
                pl.BlockSpec((dn, de), lambda i: (0, 0)),    # w1 (bf16, resident)
                pl.BlockSpec((1, de), lambda i: (0, 0)),     # b1
                pl.BlockSpec((de, de), lambda i: (0, 0)),    # w2 (bf16, resident)
                pl.BlockSpec((1, de), lambda i: (0, 0)),     # b2
                pl.BlockSpec((dc, dce), lambda i: (0, 0)),   # wc
                pl.BlockSpec((1, dce), lambda i: (0, 0)),    # bc
            ],
            out_specs=[
                pl.BlockSpec((tm, de), lambda i: (i, 0)),
                pl.BlockSpec((tm, dce), lambda i: (i, 0)),
            ],
        ),
        compiler_params=pltpu.CompilerParams(
            dimension_semantics=("parallel",)),
    )(packed, sintab, w1, b1, w2, b2, wc, bc)


def time_embed(nl, sintab, w1, b1, w2, b2, out_dtype):
    n = nl.shape[0]
    dn = sintab.shape[1]
    de = w1.shape[1]
    tm = _row_tile(n)

    return pl.pallas_call(
        _time_embed_kernel,
        out_shape=jax.ShapeDtypeStruct((n, de), out_dtype),
        grid_spec=pltpu.PrefetchScalarGridSpec(
            num_scalar_prefetch=0,
            grid=(pl.cdiv(n, tm),),
            in_specs=[
                pl.BlockSpec((tm, 1), lambda i: (i, 0)),
                pl.BlockSpec((2, dn), lambda i: (0, 0)),
                pl.BlockSpec((dn, de), lambda i: (0, 0)),
                pl.BlockSpec((1, de), lambda i: (0, 0)),
                pl.BlockSpec((de, de), lambda i: (0, 0)),
                pl.BlockSpec((1, de), lambda i: (0, 0)),
            ],
            out_specs=pl.BlockSpec((tm, de), lambda i: (i, 0)),
        ),
        compiler_params=pltpu.CompilerParams(
            dimension_semantics=("parallel",)),
    )(nl, sintab, w1, b1, w2, b2)


# ----------------------------------------------------------------------------
# Pure-JAX reference (for the self-check).
# ----------------------------------------------------------------------------
def sinusoidal_embedding(t, dim):
    # TODO(synk): assumed lucidrains SinusoidalPosEmb convention ([sin|cos],
    # log(10000)/(half-1)); verify against the original PyTorch module.
    half = dim // 2
    freqs = jnp.exp(-math.log(10000.0) *
                    jnp.arange(half, dtype=jnp.float32) / (half - 1))
    args = t.astype(jnp.float32)[:, None] * freqs[None, :]
    return jnp.concatenate([jnp.sin(args), jnp.cos(args)], axis=-1)


def _ref_embed(backbone, noise_levels, external_cond=None, external_cond_mask=None):
    B, T = noise_levels.shape
    N = B * T
    temb = sinusoidal_embedding(noise_levels.reshape(N), backbone.noise_level_dim)
    h = temb @ backbone.w1.astype(jnp.float32) + backbone.b1
    h = h * jax.nn.sigmoid(h)
    ref_noise = (h @ backbone.w2.astype(jnp.float32) + backbone.b2).reshape(B, T, -1)
    ref_cond = None
    if external_cond is not None and backbone.wc is not None:
        keep = 1.0
        if external_cond_mask is not None:
            keep = 1.0 - external_cond_mask.reshape(N, 1).astype(jnp.float32)
        ref_cond = ((external_cond.reshape(N, -1).astype(jnp.float32) @ backbone.wc
                     + backbone.bc) * keep).reshape(B, T, -1)
    return ref_noise, ref_cond


# ----------------------------------------------------------------------------
# BaseBackbone (JAX/Pallas version of the concrete pieces; forward is abstract)
# ----------------------------------------------------------------------------
class BaseBackbonePallas:
    def __init__(self, key, x_shape, external_cond_dim,
                 noise_level_emb_dim=128, external_cond_emb_dim=128,
                 use_causal_mask=True, emb_dtype=jnp.bfloat16):
        self.x_shape = x_shape
        self.external_cond_dim = external_cond_dim
        self.use_causal_mask = use_causal_mask
        self.noise_level_emb_dim = noise_level_emb_dim
        self.external_cond_emb_dim = external_cond_emb_dim
        self.noise_level_dim = max(noise_level_emb_dim // 4, 32)
        # bf16 embeddings halve output writeback (the dominant HBM cost);
        # pass emb_dtype=jnp.float32 if exact-dtype parity is required.
        self.emb_dtype = emb_dtype

        half = self.noise_level_dim // 2
        freqs = jnp.exp(-math.log(10000.0) *
                        jnp.arange(half, dtype=jnp.float32) / (half - 1))
        shift = jnp.concatenate([jnp.zeros((half,), jnp.float32),
                                 jnp.full((half,), math.pi / 2, jnp.float32)])
        # Row 0: repeated freqs; row 1: phase shift (sin/cos via one sin()).
        self.sintab = jnp.stack([jnp.concatenate([freqs, freqs]), shift])  # (2, Dn)

        k1, k2, k3 = jax.random.split(key, 3)
        d_in, d_emb = self.noise_level_dim, self.noise_level_emb_dim
        # StochasticTimeEmbedding MLP params (weights stored bf16: MXU-native,
        # halves weight DMA; biases / elementwise stay f32).
        self.w1 = (jax.random.normal(k1, (d_in, d_emb), jnp.float32)
                   / math.sqrt(d_in)).astype(jnp.bfloat16)
        self.b1 = jnp.zeros((1, d_emb), jnp.float32)
        self.w2 = (jax.random.normal(k2, (d_emb, d_emb), jnp.float32)
                   / math.sqrt(d_emb)).astype(jnp.bfloat16)
        self.b2 = jnp.zeros((1, d_emb), jnp.float32)
        # RandomDropoutCondEmbedding params (f32: used on the VPU path).
        if external_cond_dim:
            self.wc = jax.random.normal(
                k3, (external_cond_dim, external_cond_emb_dim), jnp.float32
            ) / math.sqrt(external_cond_dim)
            self.bc = jnp.zeros((1, external_cond_emb_dim), jnp.float32)
        else:
            self.wc = self.bc = None

    def embed_conditions(self, noise_levels, external_cond=None,
                         external_cond_mask=None):
        """Concrete portion of BaseBackbone's forward path (abstract subclasses
        consume these embeddings)."""
        B, T = noise_levels.shape
        N = B * T
        nl = noise_levels.reshape(N, 1).astype(jnp.float32)

        if self.external_cond_dim and external_cond is not None:
            cond = external_cond.reshape(N, self.external_cond_dim).astype(jnp.float32)
            if external_cond_mask is None:
                mask = jnp.zeros((N, 1), jnp.float32)
            else:
                mask = external_cond_mask.reshape(N, 1).astype(jnp.float32)
            # Pack the three narrow row-wise inputs into one lane-packed stream.
            packed = jnp.concatenate([nl, mask, cond], axis=-1)   # (N, 2+Dc)
            # TODO(synk): training-time stochastic dropout (dropout_prob > 0)
            # would use pltpu.prng_seed / prng_random_bits in-kernel; only the
            # explicit-mask path is implemented here.
            noise_emb, cond_emb = fused_condition_embed(
                packed, self.sintab, self.w1, self.b1, self.w2, self.b2,
                self.wc, self.bc, self.emb_dtype)
            return (noise_emb.reshape(B, T, self.noise_level_emb_dim),
                    cond_emb.reshape(B, T, self.external_cond_emb_dim))

        # TODO(synk): use_fourier_noise_embedding=True variant not implemented.
        noise_emb = time_embed(nl, self.sintab, self.w1, self.b1, self.w2,
                               self.b2, self.emb_dtype)
        return noise_emb.reshape(B, T, self.noise_level_emb_dim), None


# ----------------------------------------------------------------------------
if __name__ == "__main__":
    key = jax.random.PRNGKey(0)
    k_params, k_noise, k_cond, k_mask = jax.random.split(key, 4)

    B, T = 2, 8
    C, H, W = 4, 16, 16                  # x_shape (frames are (C,H,W) latents)
    external_cond_dim = 4

    backbone = BaseBackbonePallas(
        k_params, x_shape=(C, H, W), external_cond_dim=external_cond_dim,
        noise_level_emb_dim=128, external_cond_emb_dim=128,
        emb_dtype=jnp.bfloat16,
    )

    noise_levels = jax.random.randint(k_noise, (B, T), 0, 1000, dtype=jnp.int32)
    external_cond = jax.random.normal(k_cond, (B, T, external_cond_dim), jnp.float32)
    external_cond_mask = (jax.random.uniform(k_mask, (B, T)) < 0.25).astype(jnp.float32)

    noise_emb, cond_emb = backbone.embed_conditions(
        noise_levels, external_cond, external_cond_mask)
    noise_emb = jax.block_until_ready(noise_emb)
    cond_emb = jax.block_until_ready(cond_emb)

    ref_noise, ref_cond = _ref_embed(backbone, noise_levels, external_cond,
                                     external_cond_mask)
    # bf16 MXU + bf16 outputs => looser tolerance on the MLP path.
    assert jnp.allclose(noise_emb.astype(jnp.float32), ref_noise,
                        atol=5e-2, rtol=5e-2), "noise emb mismatch"
    assert jnp.allclose(cond_emb.astype(jnp.float32), ref_cond,
                        atol=2e-2, rtol=2e-2), "cond emb mismatch"

    # Ragged row count (N=15, not a multiple of the 8-row tile) exercises the
    # masked final block: no wrapper pad / output slice is needed.
    B2, T2 = 3, 5
    nl2 = jax.random.randint(k_noise, (B2, T2), 0, 1000, dtype=jnp.int32)
    cond2 = jax.random.normal(k_cond, (B2, T2, external_cond_dim), jnp.float32)
    mask2 = (jax.random.uniform(k_mask, (B2, T2)) < 0.5).astype(jnp.float32)
    ne2, ce2 = backbone.embed_conditions(nl2, cond2, mask2)
    ne2 = jax.block_until_ready(ne2)
    ce2 = jax.block_until_ready(ce2)
    rn2, rc2 = _ref_embed(backbone, nl2, cond2, mask2)
    assert jnp.allclose(ne2.astype(jnp.float32), rn2, atol=5e-2, rtol=5e-2), \
        "ragged noise emb mismatch"
    assert jnp.allclose(ce2.astype(jnp.float32), rc2, atol=2e-2, rtol=2e-2), \
        "ragged cond emb mismatch"

    # No-external-cond fallback path.
    nm_only, none_cond = backbone.embed_conditions(noise_levels)
    nm_only = jax.block_until_ready(nm_only)
    assert none_cond is None
    assert jnp.allclose(nm_only.astype(jnp.float32), ref_noise, atol=5e-2, rtol=5e-2)

    print("KERNEL_OK")
</pallas_src>

<mosaic_0001>
module attributes {stable_mosaic.version = 11 : i64} {
  func.func @_fused_embed_kernel(%arg0: i32, %arg1: memref<8x6xf32, #tpu.memory_space<vmem>>, %arg2: memref<2x32xf32, #tpu.memory_space<vmem>>, %arg3: memref<32x128xbf16, #tpu.memory_space<vmem>>, %arg4: memref<1x128xf32, #tpu.memory_space<vmem>>, %arg5: memref<128x128xbf16, #tpu.memory_space<vmem>>, %arg6: memref<1x128xf32, #tpu.memory_space<vmem>>, %arg7: memref<4x128xf32, #tpu.memory_space<vmem>>, %arg8: memref<1x128xf32, #tpu.memory_space<vmem>>, %arg9: memref<8x128xbf16, #tpu.memory_space<vmem>>, %arg10: memref<8x128xbf16, #tpu.memory_space<vmem>>) attributes {dimension_semantics = [#tpu.dimension_semantics<parallel>], iteration_bounds = array<i64: 2>, scalar_prefetch = 0 : i64, scratch_operands = 0 : i64, tpu.core_type = #tpu.core_type<tc>, window_params = [{transform_indices = @transform_0, window_bounds = array<i64: 8, 6>}, {pipeline_mode = #tpu.pipeline_mode<synchronous>, transform_indices = @transform_1, window_bounds = array<i64: 2, 32>}, {pipeline_mode = #tpu.pipeline_mode<synchronous>, transform_indices = @transform_2, window_bounds = array<i64: 32, 128>}, {pipeline_mode = #tpu.pipeline_mode<synchronous>, transform_indices = @transform_3, window_bounds = array<i64: 1, 128>}, {pipeline_mode = #tpu.pipeline_mode<synchronous>, transform_indices = @transform_4, window_bounds = array<i64: 128, 128>}, {pipeline_mode = #tpu.pipeline_mode<synchronous>, transform_indices = @transform_5, window_bounds = array<i64: 1, 128>}, {pipeline_mode = #tpu.pipeline_mode<synchronous>, transform_indices = @transform_6, window_bounds = array<i64: 4, 128>}, {pipeline_mode = #tpu.pipeline_mode<synchronous>, transform_indices = @transform_7, window_bounds = array<i64: 1, 128>}, {transform_indices = @transform_8, window_bounds = array<i64: 8, 128>}, {transform_indices = @transform_9, window_bounds = array<i64: 8, 128>}]} {
    %c0 = arith.constant 0 : index
    %c0_0 = arith.constant 0 : index
    %0 = vector.load %arg1[%c0, %c0_0] : memref<8x6xf32, #tpu.memory_space<vmem>>, vector<8x6xf32>
    %1 = vector.extract_strided_slice %0 {offsets = [0, 0], sizes = [8, 1], strides = [1, 1]} : vector<8x6xf32> to vector<8x1xf32>
    %2 = vector.extract_strided_slice %0 {offsets = [0, 1], sizes = [8, 1], strides = [1, 1]} : vector<8x6xf32> to vector<8x1xf32>
    %cst = arith.constant 1.000000e+00 : f32
    %3 = vector.broadcast %cst : f32 to vector<8x1xf32>
    %4 = arith.subf %3, %2 : vector<8x1xf32>
    %5 = vector.extract_strided_slice %0 {offsets = [0, 2], sizes = [8, 4], strides = [1, 1]} : vector<8x6xf32> to vector<8x4xf32>
    %c0_1 = arith.constant 0 : index
    %c0_2 = arith.constant 0 : index
    %6 = vector.load %arg2[%c0_1, %c0_2] : memref<2x32xf32, #tpu.memory_space<vmem>>, vector<1x32xf32>
    %7 = vector.broadcast %1 : vector<8x1xf32> to vector<8x32xf32>
    %8 = vector.broadcast %6 : vector<1x32xf32> to vector<8x32xf32>
    %9 = arith.mulf %7, %8 : vector<8x32xf32>
    %c1 = arith.constant 1 : index
    %c0_3 = arith.constant 0 : index
    %10 = vector.load %arg2[%c1, %c0_3] : memref<2x32xf32, #tpu.memory_space<vmem>>, vector<1x32xf32>
    %11 = vector.broadcast %10 : vector<1x32xf32> to vector<8x32xf32>
    %12 = arith.addf %9, %11 : vector<8x32xf32>
    %13 = math.sin %12 : vector<8x32xf32>
    %14 = arith.truncf %13 : vector<8x32xf32> to vector<8x32xbf16>
    %c0_4 = arith.constant 0 : index
    %c0_5 = arith.constant 0 : index
    %15 = vector.load %arg3[%c0_4, %c0_5] : memref<32x128xbf16, #tpu.memory_space<vmem>>, vector<32x128xbf16>
    %cst_6 = arith.constant dense<0.000000e+00> : vector<8x128xf32>
    %16 = tpu.matmul %14, %15, %cst_6 {dimension_numbers = #tpu.dot_dimension_numbers<[1], [0], [0], [1], [0, 0, 1, 1], [], []>} : vector<8x32xbf16>, vector<32x128xbf16>, vector<8x128xf32> -> vector<8x128xf32>
    %c0_7 = arith.constant 0 : index
    %c0_8 = arith.constant 0 : index
    %17 = vector.load %arg4[%c0_7, %c0_8] : memref<1x128xf32, #tpu.memory_space<vmem>>, vector<1x128xf32>
    %18 = vector.broadcast %17 : vector<1x128xf32> to vector<8x128xf32>
    %19 = arith.addf %16, %18 : vector<8x128xf32>
    %20 = arith.negf %19 : vector<8x128xf32>
    %21 = math.exp %20 : vector<8x128xf32>
    %cst_9 = arith.constant 1.000000e+00 : f32
    %22 = vector.broadcast %cst_9 : f32 to vector<8x128xf32>
    %23 = arith.addf %22, %21 : vector<8x128xf32>
    %24 = arith.divf %22, %23 : vector<8x128xf32>
    %25 = arith.mulf %19, %24 : vector<8x128xf32>
    %26 = arith.truncf %25 : vector<8x128xf32> to vector<8x128xbf16>
    %c0_10 = arith.constant 0 : index
    %c0_11 = arith.constant 0 : index
    %27 = vector.load %arg5[%c0_10, %c0_11] : memref<128x128xbf16, #tpu.memory_space<vmem>>, vector<128x128xbf16>
    %cst_12 = arith.constant dense<0.000000e+00> : vector<8x128xf32>
    %28 = tpu.matmul %26, %27, %cst_12 {dimension_numbers = #tpu.dot_dimension_numbers<[1], [0], [0], [1], [0, 0, 1, 1], [], []>} : vector<8x128xbf16>, vector<128x128xbf16>, vector<8x128xf32> -> vector<8x128xf32>
    %c0_13 = arith.constant 0 : index
    %c0_14 = arith.constant 0 : index
    %29 = vector.load %arg6[%c0_13, %c0_14] : memref<1x128xf32, #tpu.memory_space<vmem>>, vector<1x128xf32>
    %30 = vector.broadcast %29 : vector<1x128xf32> to vector<8x128xf32>
    %31 = arith.addf %28, %30 : vector<8x128xf32>
    %32 = arith.truncf %31 : vector<8x128xf32> to vector<8x128xbf16>
    %c0_15 = arith.constant 0 : index
    %c0_16 = arith.constant 0 : index
    %33 = vector.load %arg9[%c0_15, %c0_16] : memref<8x128xbf16, #tpu.memory_space<vmem>>, vector<8x128xbf16>
    tpu.vector_store %arg9[%c0_15, %c0_16], %32 {strides = array<i32>} : memref<8x128xbf16, #tpu.memory_space<vmem>>, vector<8x128xbf16>,
    %c0_17 = arith.constant 0 : index
    %c0_18 = arith.constant 0 : index
    %34 = vector.load %arg7[%c0_17, %c0_18] : memref<4x128xf32, #tpu.memory_space<vmem>>, vector<4x128xf32>
    %c0_19 = arith.constant 0 : index
    %c0_20 = arith.constant 0 : index
    %35 = vector.load %arg8[%c0_19, %c0_20] : memref<1x128xf32, #tpu.memory_space<vmem>>, vector<1x128xf32>
    %36 = vector.shape_cast %35 : vector<1x128xf32> to vector<1x128xf32>
    %37 = vector.broadcast %36 : vector<1x128xf32> to vector<8x128xf32>
    %38 = vector.extract_strided_slice %5 {offsets = [0, 0], sizes = [8, 1], strides = [1, 1]} : vector<8x4xf32> to vector<8x1xf32>
    %39 = vector.extract_strided_slice %34 {offsets = [0, 0], sizes = [1, 128], strides = [1, 1]} : vector<4x128xf32> to vector<1x128xf32>
    %40 = vector.broadcast %38 : vector<8x1xf32> to vector<8x128xf32>
    %41 = vector.broadcast %39 : vector<1x128xf32> to vector<8x128xf32>
    %42 = arith.mulf %40, %41 : vector<8x128xf32>
    %43 = arith.addf %37, %42 : vector<8x128xf32>
    %44 = vector.extract_strided_slice %5 {offsets = [0, 1], sizes = [8, 1], strides = [1, 1]} : vector<8x4xf32> to vector<8x1xf32>
    %45 = vector.extract_strided_slice %34 {offsets = [1, 0], sizes = [1, 128], strides = [1, 1]} : vector<4x128xf32> to vector<1x128xf32>
    %46 = vector.broadcast %44 : vector<8x1xf32> to vector<8x128xf32>
    %47 = vector.broadcast %45 : vector<1x128xf32> to vector<8x128xf32>
    %48 = arith.mulf %46, %47 : vector<8x128xf32>
    %49 = arith.addf %43, %48 : vector<8x128xf32>
    %50 = vector.extract_strided_slice %5 {offsets = [0, 2], sizes = [8, 1], strides = [1, 1]} : vector<8x4xf32> to vector<8x1xf32>
    %51 = vector.extract_strided_slice %34 {offsets = [2, 0], sizes = [1, 128], strides = [1, 1]} : vector<4x128xf32> to vector<1x128xf32>
    %52 = vector.broadcast %50 : vector<8x1xf32> to vector<8x128xf32>
    %53 = vector.broadcast %51 : vector<1x128xf32> to vector<8x128xf32>
    %54 = arith.mulf %52, %53 : vector<8x128xf32>
    %55 = arith.addf %49, %54 : vector<8x128xf32>
    %56 = vector.extract_strided_slice %5 {offsets = [0, 3], sizes = [8, 1], strides = [1, 1]} : vector<8x4xf32> to vector<8x1xf32>
    %57 = vector.extract_strided_slice %34 {offsets = [3, 0], sizes = [1, 128], strides = [1, 1]} : vector<4x128xf32> to vector<1x128xf32>
    %58 = vector.broadcast %56 : vector<8x1xf32> to vector<8x128xf32>
    %59 = vector.broadcast %57 : vector<1x128xf32> to vector<8x128xf32>
    %60 = arith.mulf %58, %59 : vector<8x128xf32>
    %61 = arith.addf %55, %60 : vector<8x128xf32>
    %62 = vector.broadcast %4 : vector<8x1xf32> to vector<8x128xf32>
    %63 = arith.mulf %61, %62 : vector<8x128xf32>
    %64 = arith.truncf %63 : vector<8x128xf32> to vector<8x128xbf16>
    %c0_21 = arith.constant 0 : index
    %c0_22 = arith.constant 0 : index
    %65 = vector.load %arg10[%c0_21, %c0_22] : memref<8x128xbf16, #tpu.memory_space<vmem>>, vector<8x128xbf16>
    tpu.vector_store %arg10[%c0_21, %c0_22], %64 {strides = array<i32>} : memref<8x128xbf16, #tpu.memory_space<vmem>>, vector<8x128xbf16>,
    return
  }
  func.func @transform_0(%arg0: i32) -> (i32, i32) {
    %c0_i32 = arith.constant 0 : i32
    %c0_i32_0 = arith.constant 0 : i32
    return %arg0, %c0_i32 : i32, i32
  }
  func.func @transform_1(%arg0: i32) -> (i32, i32) {
    %c0_i32 = arith.constant 0 : i32
    %c0_i32_0 = arith.constant 0 : i32
    %c0_i32_1 = arith.constant 0 : i32
    return %c0_i32, %c0_i32_0 : i32, i32
  }
  func.func @transform_2(%arg0: i32) -> (i32, i32) {
    %c0_i32 = arith.constant 0 : i32
    %c0_i32_0 = arith.constant 0 : i32
    %c0_i32_1 = arith.constant 0 : i32
    return %c0_i32, %c0_i32_0 : i32, i32
  }
  func.func @transform_3(%arg0: i32) -> (i32, i32) {
    %c0_i32 = arith.constant 0 : i32
    %c0_i32_0 = arith.constant 0 : i32
    %c0_i32_1 = arith.constant 0 : i32
    return %c0_i32, %c0_i32_0 : i32, i32
  }
  func.func @transform_4(%arg0: i32) -> (i32, i32) {
    %c0_i32 = arith.constant 0 : i32
    %c0_i32_0 = arith.constant 0 : i32
    %c0_i32_1 = arith.constant 0 : i32
    return %c0_i32, %c0_i32_0 : i32, i32
  }
  func.func @transform_5(%arg0: i32) -> (i32, i32) {
    %c0_i32 = arith.constant 0 : i32
    %c0_i32_0 = arith.constant 0 : i32
    %c0_i32_1 = arith.constant 0 : i32
    return %c0_i32, %c0_i32_0 : i32, i32
  }
  func.func @transform_6(%arg0: i32) -> (i32, i32) {
    %c0_i32 = arith.constant 0 : i32
    %c0_i32_0 = arith.constant 0 : i32
    %c0_i32_1 = arith.constant 0 : i32
    return %c0_i32, %c0_i32_0 : i32, i32
  }
  func.func @transform_7(%arg0: i32) -> (i32, i32) {
    %c0_i32 = arith.constant 0 : i32
    %c0_i32_0 = arith.constant 0 : i32
    %c0_i32_1 = arith.constant 0 : i32
    return %c0_i32, %c0_i32_0 : i32, i32
  }
  func.func @transform_8(%arg0: i32) -> (i32, i32) {
    %c0_i32 = arith.constant 0 : i32
    %c0_i32_0 = arith.constant 0 : i32
    return %arg0, %c0_i32 : i32, i32
  }
  func.func @transform_9(%arg0: i32) -> (i32, i32) {
    %c0_i32 = arith.constant 0 : i32
    %c0_i32_0 = arith.constant 0 : i32
    return %arg0, %c0_i32 : i32, i32
  }
}

</mosaic_0001>

<bundles_post_ra>
// kernel: tpu_custom_call.1
= control target key start
LH: loop header
LB: loop body
LE: loop exit
PB: predicated region body
PF: predicated region fallthrough
CT: control target
= control target key end

     0   :  { %s1434_s0 = inlined_call_operand.vmem [shape: f32[16,6], index: 0, kind: input, shape index: {}]   ;;  %s1435_s1 = inlined_call_operand.vmem [shape: f32[2,32], index: 1, kind: input, shape index: {}]   ;;  %s1436_s2 = inlined_call_operand.vmem [shape: bf16[32,128], index: 2, kind: input, shape index: {}]   ;;  %s1437_s3 = inlined_call_operand.vmem [shape: f32[1,128], index: 3, kind: input, shape index: {}]   ;;  %s1438_s4 = inlined_call_operand.hbm [shape: bf16[128,128], index: 4, kind: input, shape index: {}]   ;;  %s1439_s5 = inlined_call_operand.vmem [shape: f32[1,128], index: 5, kind: input, shape index: {}]   ;;  %s1440_s6 = inlined_call_operand.vmem [shape: f32[4,128], index: 6, kind: input, shape index: {}]   ;;  %s1441_s7 = inlined_call_operand.vmem [shape: f32[1,128], index: 7, kind: input, shape index: {}]   ;;  %s1442_s8 = inlined_call_operand.hbm [shape: bf16[16,128], index: 8, kind: output, shape index: {0}]   ;;  %s1443_s9 = inlined_call_operand.hbm [shape: bf16[16,128], index: 9, kind: output, shape index: {1}]  }
   0x1   :  { %1446 = sst [smem:[#allocation11_spill]] %s1434_s0 }
   0x2   :  { %1447 = sst [smem:[#allocation12_spill]] %s1435_s1 }
   0x3   :  { %15 = vsyncpa [#allocation3], 0 }
   0x4   :  { %16 = vsyncpa [#allocation4], 0 }
   0x5   :  { %18 = vsyncpa [#allocation4 + $0x1], 0 }
   0x6   :  { %19 = vsyncpa [#allocation7], 0 }
   0x7   :  { %21 = vsyncpa [#allocation7 + $0x1], 0  ;;  %s1224_s30 = smov 0   ;;  %s1226_s10 = smov 0  }
   0x8   :  { %s1228_s11 = smov 0   ;;  %s1230_s12 = smov 0  }
   0x9 LB: > { %s1245_s13 = sadd.s32 4294967295, %s1153_s12   ;;  %s858_s14 = sadd.s32 4294967294, %s1153_s12   ;;  %s1153_s12 = sphi %s1230_s12, %s1459_s12   ;;  %s1149_s11 = sphi %s1228_s11, %s1458_s11   ;;  %s1145_s10 = sphi %s1226_s10, %s1457_s10   ;;  %s1141_s30 = sphi %s1224_s30, %s1456_s30  }
   0xa   : > { %s1249_s15 = sadd.s32 1, %s1153_s12   ;;  %s207_s16 = sadd.s32 1, %s1149_s11 }
   0xb   : > { %s204_s17 = ssub.s32 %s1153_s12, %s1249_s15  ;;  %p217_p0 = scmp.ne.s32.totalorder %s1149_s11, %s1145_s10 }
   0xc   : > { %p205_p1 = scmp.eq.s32.totalorder %s204_s17, 0  ;;  %p218_p2 = scmp.eq.s32.totalorder %s1245_s13, 1 }
   0xd   : > { %p223_p3 = scmp.ne.s32.totalorder %s1145_s10, %s1141_s30  ;;  %p224_p4 = scmp.eq.s32.totalorder %s858_s14, 1 }
   0xe   : > { %s1260_s18 = scalar_select %p205_p1, %s1149_s11, %s207_s16  }
   0xf   : > { %p1262_p5 = por %p218_p2, %p217_p0  ;;  %p1266_p6 = por %p224_p4, %p223_p3 }
  0x10   : > { %p859_p7 = scmp.ge.s32.totalorder %s1153_s12, 1  ;;  %p257_p8 = scmp.lt.s32.totalorder %s1153_s12, 3 }
  0x11   : > { %s1449_s20 = scalar_select %p1266_p6, 1, 0 }
  0x12   : > { %p957_p9 = scmp.eq.s32.totalorder %s1245_s13, 0  ;;  %p1273_p10 = pnand %p859_p7, %p257_p8 }
  0x13   : > { %s1155_s22 = smov [#allocation2]  }
  0x14   : > { %s278_s23 = sshll.u32 %s1155_s22, 4  ;;  %p946_p11 = pneg %p1273_p10  ;;  %s279_s23 = int_to_ptr.vmem [resolvable:$true] %s278_s23 }
  0x15   : > { %s1044_s24 = scalar_lea.vmem %s279_s23, 1024  ;;  %p1052_p3 = scmp.lt.s32.totalorder %s279_s23, %s279_s23 }
  0x16   : > { %p947_p12 = pnand %p957_p9, %p946_p11  ;;  %p1045_p0 = scmp.ne.s32.totalorder %s279_s23, %s1044_s24 }
  0x17   : > { %p1053_p4 = scmp.lt.s32.totalorder %s1044_s24, %s1044_s24 }
  0x18   : > { %p1035_p13 = pneg %p947_p12 }
  0x19   : > { %p1054_p6 = por %p1053_p4, %p1052_p3 }
  0x1a   : > { %p1047_p1 = pnand %p1045_p0, %p1035_p13 }
  0x1c   : > { %p1048_p2 = pneg %p1047_p1 }
  0x1e   : > { %p1055_p7 = pnand %p1054_p6, %p1048_p2 }
  0x20   : > { %1058 = shalt.err (!%p1055_p7)
}
  0x21   : > { %s1156_s25 = smov 64   ;;  %s1157_s26 = smov 4  }
  0x22   : > { %949 = dma.hbm_to_vmem [thread:$0]  (!%p947_p12), %s1438_s4, 1024, %s279_s23, [#allocation3], %s1156_s25, %s1156_s25, %s1157_s26  }
  0x23   : > { %310 = sbr.rel (%p1273_p10) target bundleno = 703 (0x2bf), region = 52 }
  0x28   : > { %1128 = dma.done.wait (%p957_p9), [#allocation3], 1024  }
  0x29   : > { %1130 = vsyncadd (%p957_p9), [#allocation3], 4294966272  ;;  %p350_p8 = scmp.lt.s32.totalorder %s1245_s13, 1  ;;  %v1158_v0 = vmov 0   ;;  %s1451_s0 = sld [smem:[#allocation11_spill]]  ;;  %v1015_v2 = vld [vmem:[%s1436_s2 + $0x8] sm:$0xff]  }
  0x2a   : > { %1009 = vset.pattern.permute.xlu0 %v1158_v0  ;;  %v1159_v3 = vmov 0.0   ;;  %vm1160_vm0 = vmmov 0   ;;  %v1016_v4 = vld [vmem:[%s1436_s2] sm:$0xff]   ;;  %s1452_s1 = sld [smem:[#allocation12_spill]]  ;;  %v1161_v20 = vmov 683565275  }
  0x2b   : > { %s351_s29 = scalar_select %p350_p8, %s1245_s13, 1  ;;  %906 = vmatprep.subr.bf16.mxu0 %v1159_v3  ;;  %910 = vmatprep.mubr.msk.bf16.mxu0 %vm1160_vm0, %v1159_v3  ;;  %v1162_v22 = vmov 2475754826   ;;  %v1163_v25 = vmov 2131351028   ;;  %vm502_vm14 = vcmask 261120  }
  0x2c   : > { %907 = vmatpush3.bf16.msra.mxu0 %v1015_v2  ;;  %914 = vmatprep.subr.bf16.mxu1 %v1159_v3  ;;  %v1164_v28 = vmov 2102212464   ;;  %v1165_v31 = vmov 920167782   ;;  %v1166_v34 = vmov 1326507024  }
  0x2d   : > { %s866_s14 = sshll.u32 %s351_s29, 3  ;;  %908 = vmatprep.subr.bf16.mxu0 %v1159_v3  ;;  %930 = vmatprep.mubr.msk.bf16.mxu1 %vm1160_vm0, %v1159_v3  ;;  %s1358_s24 = sand.u32 1, %s1145_s10  }
  0x2e   : > { %s1444_s25 = sshll.u32 %s1358_s24, 2  ;;  %s1445_s27 = sshll.u32 %s1245_s13, 6 }
  0x2f   : > { %s353_s22 = scalar_lea.vmem %s1451_s0, %s866_s14  ;;  %s349_s26 = scalar_lea.vmem [#allocation6], %s1444_s25 }
  0x30   : > { %v1295_v1 = vld [vmem:[%s353_s22] sm:$0xff]  ;;  %909 = vmatpush3.bf16.msra.mxu0 %v1016_v4  ;;  %s753_s14 = scalar_lea.hbm %s1443_s9, %s1445_s27  ;;  %s755_s16 = sshll.u32 %s349_s26, 4  ;;  %s756_s16 = int_to_ptr.vmem [resolvable:$true] %s755_s16 }
  0x31   : > { %360 = vperm.xlu0 %1009, %v1295_v1   ;;  %v867_v5 = vld [vmem:[%s1452_s1] ss:$0 sm:$0xff]  ;;  %v868_v6 = vld [vmem:[%s1452_s1 + $0x1] ss:$0 sm:$0xff]  ;;  %s729_s17 = scalar_lea.sflag [#allocation7], %s1358_s24  ;;  %s1059_s22 = scalar_lea.vmem %s756_s16, 64 }
  0x32   : > { %p1060_p6 = scmp.ne.s32.totalorder %s756_s16, %s1059_s22  ;;  %s1172_s21 = smov [#allocation6]  }
  0x33   : > { %s1063_s23 = sshll.u32 %s1172_s21, 4  ;;  %s1064_s23 = int_to_ptr.vmem [resolvable:$false] %s1063_s23 }
  0x34   : > { %p1061_p9 = pnand %p1060_p6, %p1262_p5  ;;  %s1065_s0 = scalar_lea.vmem %s1064_s23, 128 }
  0x35   : > { %p1066_p11 = scmp.lt.s32.totalorder %s756_s16, %s1064_s23  ;;  %p1067_p12 = scmp.lt.s32.totalorder %s1065_s0, %s1059_s22 }
  0x36   : > { %p1062_p10 = pneg %p1061_p9 }
  0x37   : > { %p1068_p13 = por %p1067_p12, %p1066_p11 }
  0x39   : > { %p1069_p0 = pnand %p1068_p13, %p1062_p10 }
  0xac   : > { %v361_v7 = vpop.permute.xlu0 %360 }
  0xad   : > { %v367_v8 = vmul.f32 %v867_v5, %v361_v7 }
  0xaf   : > { %v1315_v9 = vadd.f32 %v868_v6, %v367_v8 }
  0xb1   : > { %v377_v10 = vand.u32 2139095040, %v1315_v9  ;;  %v374_v14 = vand.u32 2147483647, %v1315_v9  ;;  %vm376_vm8 = vcmp.lt.s32.totalorder %v1315_v9, 0  ;;  %vm466_vm13 = vweird.f32 %v1315_v9 }
  0xb3   : > { %v378_v11 = vshrl.u32 %v377_v10, 23  ;;  %v381_v17 = vand.u32 8388607, %v374_v14  ;;  %vm375_vm9 = vcmp.le.f32.partialorder %v374_v14, 0.7853982 }
  0xb5   : > { %v869_v12 = vadd.s32 4294967169, %v378_v11  ;;  %v382_v36 = vor.u32 8388608, %v381_v17 }
  0xb7   : > { %v384_v13 = vadd.s32 1, %v869_v12  ;;  %v422_v50 = vshll.u32 %v382_v36, 8 }
  0xb9   : > { %vm385_vm1 = vcmp.gt.s32.totalorder %v384_v13, 0 }
  0xba   : > { %v386_v15 = vsel %vm385_vm1, %v384_v13, 0 }
  0xbb   : > { %v388_v16 = vand.u32 31, %v386_v15  ;;  %v387_v19 = vshrl.u32 %v386_v15, 5 }
  0xbd   : > { %v389_v18 = vsub.s32 32, %v388_v16  ;;  %v391_v21 = vshll.u32 %v1161_v20, %v388_v16  ;;  %v394_v23 = vshll.u32 %v1162_v22, %v388_v16  ;;  %v397_v27 = vshll.u32 %v1163_v25, %v388_v16 }
  0xbe   : > { %v400_v30 = vshll.u32 %v1164_v28, %v388_v16  ;;  %v403_v33 = vshll.u32 %v1165_v31, %v388_v16  ;;  %vm406_vm2 = vcmp.lt.s32.totalorder %v387_v19, 1  ;;  %vm409_vm3 = vcmp.lt.s32.totalorder %v387_v19, 4 }
  0xbf   : > { %v392_v24 = vshrl.u32 %v1162_v22, %v389_v18  ;;  %v395_v26 = vshrl.u32 %v1163_v25, %v389_v18  ;;  %v398_v29 = vshrl.u32 %v1164_v28, %v389_v18  ;;  %v401_v32 = vshrl.u32 %v1165_v31, %v389_v18 }
  0xc0   : > { %v404_v35 = vshrl.u32 %v1166_v34, %v389_v18  ;;  %v390_v45 = vshrl.u32 %v1161_v20, %v389_v18  ;;  %vm408_vm4 = vcmp.lt.s32.totalorder %v387_v19, 3  ;;  %vm407_vm5 = vcmp.lt.s32.totalorder %v387_v19, 2 }
  0xc1   : > { %v393_v37 = vor.u32 %v392_v24, %v391_v21  ;;  %v396_v38 = vor.u32 %v395_v26, %v394_v23  ;;  %v399_v39 = vor.u32 %v398_v29, %v397_v27  ;;  %v402_v40 = vor.u32 %v401_v32, %v400_v30 }
  0xc2   : > { %v405_v41 = vor.u32 %v404_v35, %v403_v33 }
  0xc3   : > { %v411_v42 = vsel %vm409_vm3, %v399_v39, 2102212464  ;;  %v414_v43 = vsel %vm406_vm2, %v393_v37, %v396_v38  ;;  %v418_v44 = vsel %vm406_vm2, %v396_v38, %v399_v39  ;;  %v415_v46 = vsel %vm409_vm3, %v402_v40, 920167782 }
  0xc4   : > { %v419_v47 = vsel %vm409_vm3, %v405_v41, 1326507024  ;;  %v416_v48 = vsel %vm408_vm4, %v399_v39, %v415_v46  ;;  %v410_v51 = vsel %vm406_vm2, %v390_v45, %v393_v37  ;;  %v412_v52 = vsel %vm408_vm4, %v396_v38, %v411_v42  ;;  %v1017_v41 = vld [vmem:[#allocation2 + $0x38] sm:$0xff]   ;;  %v1018_v42 = vld [vmem:[#allocation2 + $0x30] sm:$0xff]   ;;  %v1023_v46 = vld [vmem:[#allocation2 + $0x8] sm:$0xff]  }
  0xc5   : > { %v420_v49 = vsel %vm408_vm4, %v402_v40, %v419_v47  ;;  %v417_v53 = vsel %vm407_vm5, %v414_v43, %v416_v48  ;;  %v413_v59 = vsel %vm407_vm5, %v410_v51, %v412_v52  ;;  %915 = vmatpush3.bf16.msra.mxu1 %v1017_v41  ;;  %v1019_v43 = vld [vmem:[#allocation2 + $0x28] sm:$0xff]   ;;  %v1022_v45 = vld [vmem:[#allocation2 + $0x10] sm:$0xff]   ;;  %v1024_v47 = vld [vmem:[#allocation2] sm:$0xff]   ;;  %v1167_v48 = vmov 3  }
  0xc6   : > { %v421_v54 = vsel %vm407_vm5, %v418_v44, %v420_v49  ;;  %v1324_v57 = vmul.u32.u64.low %v422_v50, %v417_v53  ;;  %v1325_v58 = vmul.u32.u64.high %v422_v50, %v417_v53, %v1324_v57  ;;  %v429_v61 = vmul.u32 %v422_v50, %v413_v59  ;;  %916 = vmatprep.subr.bf16.mxu1 %v1159_v3  ;;  %v1020_v44 = vld [vmem:[#allocation2 + $0x20] sm:$0xff]   ;;  %1011 = vset.pattern.permute.xlu1 %v1167_v48 }
  0xc7   : > { %v1321_v55 = vmul.u32.u64.low %v422_v50, %v421_v54  ;;  %v1322_v56 = vmul.u32.u64.high %v422_v50, %v421_v54, %v1321_v55  ;;  %v1168_v49 = vmov 2   ;;  %686 = vperm.xlu1 %1011, %v1295_v1   ;;  %v356_v50 = vsub.f32 1.0, %v1295_v1  ;;  %v873_v53 = vld [vmem:[%s1437_s3] ss:$0 sm:$0xff] }
  0xc8   : > { %v432_v60 = vadd.s32 1, %v1325_v58  ;;  %1010 = vset.pattern.permute.xlu0 %v1168_v49  ;;  %v1169_v51 = vmov 4   ;;  %v1170_v52 = vmov 1  }
  0xc9   : > { %vm431_vm6 = vc.u32 %v1322_v56, %v1324_v57  ;;  %v430_v12 = vadd.s32 %v1324_v57, %v1322_v56  ;;  %917 = vmatpush3.bf16.msra.mxu1 %v1018_v42  ;;  %676 = vperm.xlu0 %1010, %v1295_v1  }
  0xca   : > { %v433_v62 = vsel %vm431_vm6, %v432_v60, %v1325_v58  ;;  %918 = vmatprep.subr.bf16.mxu1 %v1159_v3 }
  0xcb   : > { %v434_v63 = vadd.s32 %v433_v62, %v429_v61  ;;  %1012 = vset.pattern.permute.xlu1 %v1169_v51  ;;  %v679_v62 = vlaneseq }
  0xcc   : > { %696 = vperm.xlu1 %1012, %v1295_v1  }
  0xcd   : > { %v435_v0 = vadd.s32 536870912, %v434_v63  ;;  %919 = vmatpush3.bf16.msra.mxu1 %v1019_v43  ;;  %1014 = vset.pattern.permute.xlu0 %v1170_v52 }
  0xce   : > { %920 = vmatprep.subr.bf16.mxu1 %v1159_v3  ;;  %717 = vperm.xlu0 %1014, %v356_v50  }
  0xcf   : > { %v436_v2 = vshrl.u32 %v435_v0, 30 }
  0xd1   : > { %v437_v4 = vshll.u32 %v436_v2, 30  ;;  %v460_v26 = vsub.s32 4, %v436_v2  ;;  %921 = vmatpush3.bf16.msra.mxu1 %v1020_v44 }
  0xd2   : > { %922 = vmatprep.subr.bf16.mxu1 %v1159_v3 }
  0xd3   : > { %v438_v5 = vsub.s32 %v434_v63, %v437_v4  ;;  %v461_v29 = vsel %vm376_vm8, %v460_v26, %v436_v2  ;;  %v680_v63 = vshrl.u32 %v679_v62, 7 }
  0xd4   : > { %v463_v30 = vsel %vm375_vm9, 0, %v461_v29 }
  0xd5   : > { %v440_v6 = vsub.s32 0, %v438_v5  ;;  %v467_v31 = vadd.s32 3, %v463_v30  ;;  %v691_v0 = vsub.s32 1, %v680_v63  ;;  %v681_v2 = vsub.s32 0, %v680_v63 }
  0xd7   : > { %v870_v7 = vmin.u32 %v440_v6, %v438_v5  ;;  %v468_v32 = vand.u32 3, %v467_v31 }
  0xd9   : > { %v442_v8 = vclz %v870_v7  ;;  %vm473_vm10 = vcmp.eq.s32.totalorder %v468_v32, 2  ;;  %vm470_vm11 = vcmp.eq.s32.totalorder %v468_v32, 0  ;;  %vm469_vm12 = vcmp.lt.s32.totalorder %v468_v32, 2 }
  0xda   : > { %v701_v7 = vsub.s32 2, %v680_v63 }
  0xdb   : > { %v871_v10 = vadd.s32 4294967294, %v442_v8 }
  0xdd   : > { %vm872_vm7 = vcmp.lt.s32.totalorder %v871_v10, 0 }
  0xde   : > { %v445_v11 = vsel %vm872_vm7, 0, %v871_v10 }
  0xdf   : > { %v446_v13 = vsub.s32 32, %v445_v11  ;;  %v450_v15 = vsub.s32 4294967266, %v445_v11  ;;  %v447_v16 = vshll.u32 %v438_v5, %v445_v11  ;;  %v887_v11 = vld [vmem:[%s1441_s7] ss:$0 sm:$0xff] }
  0xe1   : > { %v448_v17 = vshrl.u32 %v430_v12, %v446_v13  ;;  %v451_v18 = vadd.s32 127, %v450_v15 }
  0xe3   : > { %v449_v19 = vor.u32 %v448_v17, %v447_v16  ;;  %v452_v20 = vshll.u32 %v451_v18, 23 }
  0xe5   : > { %v453_v21 = vor.u32 4788187, %v452_v20  ;;  %v456_v23 = vcvt.s32.f32 %v449_v19  ;;  %v711_v19 = vsub.s32 3, %v680_v63 }
  0xe7   : > { %v454_v22 = vand.u32 2147483647, %v453_v21 }
  0xe9   : > { %v457_v24 = vmul.f32 %v456_v23, %v454_v22 }
  0xeb   : > { %v458_v25 = vxor.u32 2147483648, %v457_v24 }
  0xed   : > { %v459_v27 = vsel %vm376_vm8, %v458_v25, %v457_v24 }
  0xee   : > { %v462_v28 = vsel %vm375_vm9, %v1315_v9, %v459_v27  ;;  %v1021_v9 = vld [vmem:[#allocation2 + $0x18] sm:$0xff]  }
  0xef   : > { %1025 = vcosq.f32 %v462_v28  ;;  %923 = vmatpush3.bf16.msra.mxu1 %v1021_v9 }
  0xf0   : > { %1027 = vsinq.f32 %v462_v28  ;;  %924 = vmatprep.subr.bf16.mxu1 %v1159_v3 }
  0xf3   : > { %925 = vmatpush3.bf16.msra.mxu1 %v1022_v45 }
  0xf4   : > { %926 = vmatprep.subr.bf16.mxu1 %v1159_v3 }
  0xf7   : > { %927 = vmatpush3.bf16.msra.mxu1 %v1023_v46 }
  0xf8   : > { %928 = vmatprep.subr.bf16.mxu1 %v1159_v3  ;;  %v1171_v3 = vmov 5  }
  0xf9   : > { %1013 = vset.pattern.permute.xlu1 %v1171_v3 }
  0xfa   : > { %706 = vperm.xlu1 %1013, %v1295_v1   ;;  %v667_v1 = vld [vmem:[%s1440_s6] sm:$0xf] }
  0xfb   : > { %929 = vmatpush3.bf16.msra.mxu1 %v1024_v47  ;;  %v692_v4 = vrot.slane %v667_v1, %v691_v0  ;;  %v682_v5 = vrot.slane %v667_v1, %v681_v2  ;;  %v702_v17 = vrot.slane %v667_v1, %v701_v7  ;;  %v712_v23 = vrot.slane %v667_v1, %v711_v19 }
  0xfc   : > { %v1026_v33 = vpop.eup %1025 }
  0xfd   : > { %v1028_v34 = vpop.eup %1027  ;;  %v474_v35 = vxor.u32 2147483648, %v1026_v33 }
  0xfe   : > { %v471_v36 = vxor.u32 2147483648, %v1028_v34 }
  0xff   : > { %v475_v37 = vsel %vm473_vm10, %v474_v35, %v1028_v34 }
 0x100   : > { %v472_v38 = vsel %vm470_vm11, %v1026_v33, %v471_v36 }
 0x101   : > { %v476_v14 = vsel %vm469_vm12, %v472_v38, %v475_v37 }
 0x102   : > { %v477_v39 = vsel %vm466_vm13, nan, %v476_v14 }
 0x103   : > { %v478_v40 = vpack.c.bf16 %v477_v39, %v477_v39 }
 0x105   : > { %911 = vmatmul.mubr.msk.bf16.vlgmr.msra.gmra.mxu0 %vm502_vm14, %v478_v40 }
 0x142   : > { %v687_v10 = vpop.permute.xlu1 %686 }
 0x143   : > { %v693_v15 = vmul.f32 %v692_v4, %v687_v10 }
 0x144   : > { %v677_v12 = vpop.permute.xlu0 %676 }
 0x145   : > { %v683_v16 = vmul.f32 %v682_v5, %v677_v12 }
 0x147   : > { %v684_v18 = vadd.f32 %v887_v11, %v683_v16  ;;  %v697_v20 = vpop.permute.xlu1 %696 }
 0x148   : > { %v703_v22 = vmul.f32 %v702_v17, %v697_v20 }
 0x149   : > { %v694_v21 = vadd.f32 %v693_v15, %v684_v18  ;;  %v718_v27 = vpop.permute.xlu0 %717 }
 0x14b   : > { %v704_v24 = vadd.f32 %v703_v22, %v694_v21 }
 0x175   : > { %v707_v25 = vpop.permute.xlu1 %706 }
 0x176   : > { %v713_v26 = vmul.f32 %v712_v23, %v707_v25 }
 0x178   : > { %v714_v28 = vadd.f32 %v713_v26, %v704_v24 }
 0x17a   : > { %v720_v29 = vmul.f32 %v718_v27, %v714_v28 }
 0x17c   : > { %v721_v30 = vpack.c.bf16 %v720_v29, %v720_v29 }
 0x17e   : > { %722 = vst [vmem:[%s349_s26] sm:$0xf] %v721_v30 }
 0x1c5   : > { %v540_v54 = vpop.f32.mrf.mxu0 }
 0x1c6   : > { %v541_v55 = vadd.f32 %v873_v53, %v540_v54 }
 0x1c7   : > { %v912_v56 = vpop.f32.mrf.mxu0 }
 0x1c8   : > { %v877_v57 = vmul.f32 -1.442695, %v541_v55 }
 0x1c9   : > { %v543_v58 = vpop.f32.mrf.mxu0 }
 0x1ca   : > { %1029 = vpow2.f32 %v877_v57 }
 0x1cb   : > { %v913_v59 = vpop.f32.mrf.mxu0 }
 0x1d7   : > { %v1030_v60 = vpop.eup %1029 }
 0x1d8   : > { %v549_v61 = vadd.f32 1.0, %v1030_v60 }
 0x1da   : > { %1031 = vrcp.f32 %v549_v61 }
 0x1e7   : > { %v1032_v6 = vpop.eup %1031 }
 0x1e8   : > { %v552_v8 = vmul.f32 %v1032_v6, %v541_v55 }
 0x1ea   : > { %v553_v13 = vpack.c.bf16 %v552_v8, %v552_v8 }
 0x1ec   : > { %931 = vmatmul.mubr.bf16.vlgmr.msra.gmra.mxu1 %v553_v13 }
 0x1ed   : > { %1072 = shalt.err (!%p1069_p0)
}
 0x1ee   : > { %s1073_s25 = scalar_lea.hbm %s753_s14, 64  ;;  %s1077_s29 = scalar_lea.hbm %s1443_s9, 128 }
 0x1ef   : > { %p1074_p1 = scmp.ne.s32.totalorder %s753_s14, %s1073_s25  ;;  %p1078_p4 = scmp.lt.s32.totalorder %s753_s14, %s1443_s9 }
 0x1f0   : > { %p1079_p7 = scmp.lt.s32.totalorder %s1077_s29, %s1073_s25 }
 0x1f1   : > { %p1075_p2 = pnand %p1074_p1, %p1262_p5 }
 0x1f2   : > { %p1080_p8 = por %p1079_p7, %p1078_p4 }
 0x1f3   : > { %p1076_p3 = pneg %p1075_p2 }
 0x1f5   : > { %p1081_p6 = pnand %p1080_p8, %p1076_p3 }
 0x1f7   : > { %1084 = shalt.err (!%p1081_p6)
}
 0x1f8   : > { %943 = dma.vmem_to_hbm [thread:$0]  (%p1262_p5), %s756_s16, 64, %s753_s14, %s729_s17   ;;  %v878_v31 = vld [vmem:[%s1439_s5] ss:$0 sm:$0xff] }
 0x1f9   : > { %s1453_s21 = sshll.u32 %s1358_s24, 2  ;;  %s1454_s25 = sshll.u32 %s1245_s13, 6 }
 0x1fa   : > { %s342_s23 = scalar_lea.vmem [#allocation5], %s1453_s21  ;;  %s1392_s28 = scalar_lea.hbm %s1442_s8, %s1454_s25 }
 0x1fb   : > { %s742_s1 = sshll.u32 %s342_s23, 4  ;;  %s724_s14 = scalar_lea.sflag [#allocation4], %s1358_s24  ;;  %s1394_s1 = int_to_ptr.vmem [resolvable:$true] %s742_s1 }
 0x1fc   : > { %s1085_s16 = scalar_lea.vmem %s1394_s1, 64  ;;  %s1173_s13 = smov [#allocation5]  }
 0x1fd   : > { %p1086_p9 = scmp.ne.s32.totalorder %s1394_s1, %s1085_s16  ;;  %s1089_s17 = sshll.u32 %s1173_s13, 4  ;;  %s1090_s17 = int_to_ptr.vmem [resolvable:$false] %s1089_s17 }
 0x1fe   : > { %s1091_s29 = scalar_lea.vmem %s1090_s17, 128  ;;  %p1092_p12 = scmp.lt.s32.totalorder %s1394_s1, %s1090_s17 }
 0x1ff   : > { %p1087_p10 = pnand %p1086_p9, %p1262_p5  ;;  %p1093_p13 = scmp.lt.s32.totalorder %s1091_s29, %s1085_s16 }
 0x201   : > { %p1088_p11 = pneg %p1087_p10  ;;  %p1094_p0 = por %p1093_p13, %p1092_p12 }
 0x203   : > { %p1095_p1 = pnand %p1094_p0, %p1088_p11 }
 0x2ac   : > { %v659_v32 = vpop.f32.mrf.mxu1 }
 0x2ad   : > { %v660_v33 = vadd.f32 %v878_v31, %v659_v32 }
 0x2ae   : > { %v932_v34 = vpop.f32.mrf.mxu1 }
 0x2af   : > { %v665_v35 = vpack.c.bf16 %v660_v33, %v660_v33 }
 0x2b0   : > { %v662_v36 = vpop.f32.mrf.mxu1 }
 0x2b1   : > { %666 = vst [vmem:[%s342_s23] sm:$0xf] %v665_v35 }
 0x2b2   : > { %v933_v37 = vpop.f32.mrf.mxu1 }
 0x2b3   : > { %1098 = shalt.err (!%p1095_p1)
}
 0x2b4   : > { %s1099_s0 = scalar_lea.hbm %s1392_s28, 64  ;;  %s1103_s21 = scalar_lea.hbm %s1442_s8, 128 }
 0x2b5   : > { %p1100_p2 = scmp.ne.s32.totalorder %s1392_s28, %s1099_s0  ;;  %p1104_p7 = scmp.lt.s32.totalorder %s1392_s28, %s1442_s8 }
 0x2b6   : > { %p1105_p8 = scmp.lt.s32.totalorder %s1103_s21, %s1099_s0 }
 0x2b7   : > { %p1101_p3 = pnand %p1100_p2, %p1262_p5 }
 0x2b8   : > { %p1106_p6 = por %p1105_p8, %p1104_p7 }
 0x2b9   : > { %p1102_p4 = pneg %p1101_p3 }
 0x2bb   : > { %p1107_p9 = pnand %p1106_p6, %p1102_p4 }
 0x2bd   : > { %1110 = shalt.err (!%p1107_p9)
}
 0x2be   : > { %942 = dma.vmem_to_hbm [thread:$0]  (%p1262_p5), %s1394_s1, 64, %s1392_s28, %s724_s14  }
 0x2bf PF: > { %p959_p10 = scmp.ge.s32.totalorder %s1153_s12, 2  ;;  %s767_s27 = sand.u32 1, %s1141_s30  }
 0x2c0   : > { %p1455_p11 = scmp.ne.s32.totalorder %s1449_s20, 0  ;;  %s768_s26 = scalar_lea.sflag [#allocation4], %s767_s27 }
 0x2c2   : > { %p951_p12 = pnand %p959_p10, %p1455_p11 }
 0x2c4   : > { %p952_p13 = pneg %p951_p12 }
 0x2c6   : > { %1132 = dma.done.wait (%p952_p13), %s768_s26, 64  }
 0x2c7   : > { %1134 = vsyncadd (%p952_p13), %s768_s26, 4294967232  ;;  %s777_s16 = scalar_lea.sflag [#allocation7], %s767_s27 }
 0x2c8   : > { %1136 = dma.done.wait (%p952_p13), %s777_s16, 64  }
 0x2c9   : > { %1138 = vsyncadd (%p952_p13), %s777_s16, 4294967232  ;;  %p24_p5 = scmp.ge.s32.totalorder %s1249_s15, 4   ;;  %s1456_s30 = smov %s1145_s10 }
 0x2ca   : > { %s1457_s10 = smov %s1149_s11  ;;  %s1458_s11 = smov %s1260_s18 }
 0x2cb   : > { %s1459_s12 = smov %s1249_s15  ;;  %26 = sbr.rel (!%p24_p5) target bundleno = 9 (0x9), region = 109 }
 0x2d0   :  { %782 = vsyncpa [#allocation3], 1 }
 0x2d1   :  { %784 = vsyncpa [#allocation3 + $0x1], 1 }
 0x2d2   :  { %785 = vsyncpa [#allocation4], 1 }
 0x2d3   :  { %787 = vsyncpa [#allocation4 + $0x1], 1 }
 0x2d4   :  { %788 = vsyncpa [#allocation7], 1 }
 0x2d5   :  { %790 = vsyncpa [#allocation7 + $0x1], 1 }

</bundles_post_ra>
